<compile_context>
chip_gen: v6e
topology: v6e:2x2x1
jax: 0.10.0
libtpu: 0.0.40
codegen_flags: <defaults>
</compile_context>

<pallas_src>
import functools
import math

import jax
import jax.numpy as jnp
from jax.experimental import pallas as pl
from jax.experimental.pallas import tpu as pltpu


# ----------------------------------------------------------------------------- hw helpers
_TILE_CANDS = (1024, 512, 256, 128, 64, 32, 16, 8)


def _vmem_capacity_bytes():
    try:
        return int(pltpu.get_tpu_info().vmem_capacity_bytes)
    except Exception:
        return 64 << 20                       # conservative (v7x-sized) fallback


def _is_v5():
    try:
        return "v5" in jax.devices()[0].device_kind.lower()
    except Exception:
        return False


def _vmem_budget(capacity):
    return int(capacity * 0.85) - (8 << 20)


def _vmem_limit(est, capacity):
    return int(min(max(int(est) + (8 << 20), 32 << 20), int(capacity * 0.85)))


def _const_spec(shape):
    zeros = (0,) * len(shape)
    return pl.BlockSpec(shape, lambda *_: zeros)


def _choose_seq_tile(L, fits):
    """Largest candidate tile dividing L whose VMEM estimate fits the budget."""
    cands = [c for c in _TILE_CANDS if L % c == 0]
    if not cands:
        return L                              # full-extent block is always legal
    for c in cands:
        if fits(c):
            return c
    return cands[-1]


def _choose_rows_tile(rows, fits):
    """Largest candidate row tile that fits; rows are padded up to a multiple of it."""
    for c in _TILE_CANDS:
        if c <= rows and fits(c):
            return c, ((rows + c - 1) // c) * c
    return rows, rows                         # tiny inputs: a single full block


def _estimate_qkv_vmem(tr, D):
    return (2 * (3 * D * D) * 2 + 2 * 3 * D * 4          # bf16 wqkv + bias (double-buffered)
            + 2 * (tr * D * 4 + 3 * tr * D * 2)          # x block + 3 bf16 output blocks
            + 4 * tr * 3 * D                              # f32 qkv accumulator
            + (2 << 20))


def _estimate_layer_vmem(tq, L, D, d_ff, H, d_head, attn_bytes, exp_bytes):
    lane = -(-d_head // 128) * 128                        # lane padding of the K/V scratch
    return (2 * (D * D + 2 * D * d_ff) * 2                # bf16 matmul weights (double-buf)
            + 2 * (12 * D + d_ff) * 4                     # biases / LN params
            + 2 * (tq * D * 4 + tq * D * 2                # x, q blocks
                   + 2 * L * D * 2                        # k, v blocks
                   + tq * D * 4 + L * 4)                  # out block, delta
            + 2 * L * H * lane * 2                        # kk/vv head-split VMEM scratch
            + (2 * H * tq * L * attn_bytes if attn_bytes else 0)   # attn output block
            + H * tq * L * (4 + exp_bytes + 4)            # scores / exp / prob temporaries
            + 2 * tq * d_ff * 4                           # FFN hidden temporaries
            + (4 << 20))


# ----------------------------------------------------------------------------- kernel A
def qkv_proj_kernel(x_ref, w_ref, b_ref, q_ref, k_ref, v_ref, *, d_model):
    """Fused QKV projection: one (rows, D) x (D, 3D) bf16 matmul per step."""
    x = x_ref[...].astype(jnp.bfloat16)
    qkv = jnp.dot(x, w_ref[...], preferred_element_type=jnp.float32) + b_ref[...]
    q_ref[...] = qkv[:, :d_model].astype(q_ref.dtype)
    k_ref[...] = qkv[:, d_model:2 * d_model].astype(k_ref.dtype)
    v_ref[...] = qkv[:, 2 * d_model:].astype(v_ref.dtype)


def qkv_project(x, wqkv, bqkv, capacity):
    B, L, D = x.shape
    rows = B * L
    budget = _vmem_budget(capacity)
    tr, rows_p = _choose_rows_tile(rows, lambda t: _estimate_qkv_vmem(t, D) <= budget)
    x2 = x.reshape(rows, D)
    if rows_p != rows:
        x2 = jnp.pad(x2, ((0, rows_p - rows), (0, 0)))
    est = _estimate_qkv_vmem(tr, D)
    q2, k2, v2 = pl.pallas_call(
        functools.partial(qkv_proj_kernel, d_model=D),
        grid=(rows_p // tr,),
        in_specs=[pl.BlockSpec((tr, D), lambda i: (i, 0)),
                  _const_spec((D, 3 * D)),
                  _const_spec((1, 3 * D))],
        out_specs=(pl.BlockSpec((tr, D), lambda i: (i, 0)),) * 3,
        out_shape=(jax.ShapeDtypeStruct((rows_p, D), jnp.bfloat16),) * 3,
        compiler_params=pltpu.CompilerParams(
            dimension_semantics=("parallel",),
            vmem_limit_bytes=_vmem_limit(est, capacity)),
    )(x2, wqkv, bqkv)
    if rows_p != rows:
        q2, k2, v2 = q2[:rows], k2[:rows], v2[:rows]
    return q2.reshape(B, L, D), k2.reshape(B, L, D), v2.reshape(B, L, D)


# ----------------------------------------------------------------------------- kernel B
def encoder_layer_kernel(x_ref, q_ref, k_ref, v_ref, tau_ref, delta_ref, *rest,
                         n_heads, d_head, eps, has_mask, fuse_final_norm,
                         return_attn, exp_dtype):
    rest = list(rest)
    mask_ref = rest.pop(0) if has_mask else None
    (wo_ref, bo_ref, g1_ref, b1_ref, w1_ref, c1_ref,
     w2_ref, c2_ref, g2_ref, b2_ref) = rest[:10]
    rest = rest[10:]
    if fuse_final_norm:
        fg_ref, fb_ref = rest[:2]
        rest = rest[2:]
    else:
        fg_ref = fb_ref = None
    out_ref = rest[0]
    rest = rest[1:]
    attn_ref = None
    if return_attn:
        attn_ref = rest[0]
        rest = rest[1:]
    kk_sc, vv_sc = rest

    b = pl.program_id(0)
    qi = pl.program_id(1)
    tq = q_ref.shape[1]
    L = k_ref.shape[1]
    D = n_heads * d_head
    scale = 1.0 / math.sqrt(d_head)

    # Head-split K/V relayout cached in VMEM scratch once per batch sample; it is constant
    # across query tiles, so the XLU relayout is not repeated n_qt times.
    @pl.when(qi == 0)
    def _():
        kk_sc[...] = k_ref[0].reshape(L, n_heads, d_head)
        vv_sc[...] = v_ref[0].reshape(L, n_heads, d_head)

    # ---- DSAttention: softmax(scale * (tau * Q K^T + delta)), batched over heads ----
    # scale*tau is folded into Q (tq*D mul instead of H*tq*L); delta arrives pre-scaled.
    tau = tau_ref[b]                                                # scalar from SMEM
    q = (q_ref[0].astype(jnp.float32) * (scale * tau)).astype(jnp.bfloat16)
    q = q.reshape(tq, n_heads, d_head)

    s = jnp.einsum("qhe,khe->hqk", q, kk_sc[...],
                   preferred_element_type=jnp.float32)              # (H, tq, L) f32
    s = s + delta_ref[0]                                            # (1, L): scale*delta
    if has_mask:
        # additive mask (0 / large-negative) on the already-scaled scores; equivalent to
        # the reference's masked_fill(-inf) for -inf/-1e9 style masks.
        s = s + mask_ref[...]

    m = jnp.max(s, axis=-1, keepdims=True)
    e = jnp.exp((s - m).astype(exp_dtype))                          # bf16 exp on v6e/v7x
    l = jnp.sum(e.astype(jnp.float32), axis=-1, keepdims=True)
    p = e * pl.reciprocal(l, approx=True)                           # (H, tq, L) f32
    if return_attn:
        attn_ref[0] = p.astype(attn_ref.dtype)                      # bf16 store by default

    ao = jnp.einsum("hqk,khe->qhe", p.astype(jnp.bfloat16), vv_sc[...],
                    preferred_element_type=jnp.float32).reshape(tq, D)
    new_x = jnp.dot(ao.astype(jnp.bfloat16), wo_ref[...],
                    preferred_element_type=jnp.float32) + bo_ref[...]

    # ---- residual + LayerNorm1 (dropout == identity in eval mode) ----
    x = x_ref[0].astype(jnp.float32)
    y = x + new_x
    mu1 = jnp.mean(y, axis=-1, keepdims=True)
    yc = y - mu1
    var1 = jnp.mean(yc * yc, axis=-1, keepdims=True)
    xn = yc * jax.lax.rsqrt(var1 + eps) * g1_ref[...] + b1_ref[...]

    # ---- FFN: conv1(k=1) -> ReLU -> conv2(k=1)  == pointwise matmuls ----
    h = jnp.dot(xn.astype(jnp.bfloat16), w1_ref[...],
                preferred_element_type=jnp.float32) + c1_ref[...]
    h = jnp.maximum(h, 0.0)
    h = jnp.dot(h.astype(jnp.bfloat16), w2_ref[...],
                preferred_element_type=jnp.float32) + c2_ref[...]

    # ---- residual + LayerNorm2 ----
    z = xn + h
    mu2 = jnp.mean(z, axis=-1, keepdims=True)
    zc = z - mu2
    var2 = jnp.mean(zc * zc, axis=-1, keepdims=True)
    out = zc * jax.lax.rsqrt(var2 + eps) * g2_ref[...] + b2_ref[...]

    if fuse_final_norm:
        # Encoder's final LayerNorm fused into the last layer's epilogue.
        mu3 = jnp.mean(out, axis=-1, keepdims=True)
        oc = out - mu3
        var3 = jnp.mean(oc * oc, axis=-1, keepdims=True)
        out = oc * jax.lax.rsqrt(var3 + eps) * fg_ref[...] + fb_ref[...]

    out_ref[0] = out.astype(out_ref.dtype)


# ----------------------------------------------------------------------------- fallback LN
def layernorm_kernel(x_ref, g_ref, b_ref, o_ref, *, eps):
    x = x_ref[...].astype(jnp.float32)
    mu = jnp.mean(x, axis=-1, keepdims=True)
    xc = x - mu
    var = jnp.mean(xc * xc, axis=-1, keepdims=True)
    o_ref[...] = (xc * jax.lax.rsqrt(var + eps) * g_ref[...] + b_ref[...]).astype(o_ref.dtype)


def layer_norm(x, g, b, *, eps=1e-5):
    # Standalone final norm; only used when there are no encoder layers to fuse it into.
    B, L, D = x.shape
    rows = B * L
    capacity = _vmem_capacity_bytes()
    budget = _vmem_budget(capacity)
    est_fn = lambda t: 2 * (t * D * 4 * 2 + 2 * D * 4) + (2 << 20)
    tr, rows_p = _choose_rows_tile(rows, lambda t: est_fn(t) <= budget)
    x2 = x.reshape(rows, D)
    if rows_p != rows:
        x2 = jnp.pad(x2, ((0, rows_p - rows), (0, 0)))
    out = pl.pallas_call(
        functools.partial(layernorm_kernel, eps=eps),
        grid=(rows_p // tr,),
        in_specs=[pl.BlockSpec((tr, D), lambda i: (i, 0)),
                  _const_spec((1, D)), _const_spec((1, D))],
        out_specs=pl.BlockSpec((tr, D), lambda i: (i, 0)),
        out_shape=jax.ShapeDtypeStruct((rows_p, D), x.dtype),
        compiler_params=pltpu.CompilerParams(
            dimension_semantics=("parallel",),
            vmem_limit_bytes=_vmem_limit(est_fn(tr), capacity)),
    )(x2, jnp.asarray(g).reshape(1, D), jnp.asarray(b).reshape(1, D))
    if rows_p != rows:
        out = out[:rows]
    return out.reshape(B, L, D)


# ----------------------------------------------------------------------------- one EncoderLayer
def encoder_layer(x, params, *, n_heads, tau=None, delta=None, attn_mask=None,
                  eps=1e-5, attn_dtype=jnp.bfloat16, return_attn=True,
                  final_norm_params=None):
    B, L, D = x.shape
    assert D % n_heads == 0
    d_head = D // n_heads
    d_ff = params["w1"].shape[1]
    scale = 1.0 / math.sqrt(d_head)

    capacity = _vmem_capacity_bytes()
    exp_dtype = jnp.float32 if _is_v5() else jnp.bfloat16   # bf16 EUP only on v6e/v7x

    # De-stationary factors: reference computes softmax(scale * (tau*QK^T + delta)).
    # tau (per sample) goes to SMEM and is folded into Q in-kernel; delta is pre-multiplied
    # by scale here so the in-kernel add matches the reference exactly.
    if tau is None:
        tau_a = jnp.ones((B,), jnp.float32)
    else:
        tau_a = jnp.asarray(tau, jnp.float32).reshape(B)
    if delta is None:
        delta_a = jnp.zeros((B, 1, L), jnp.float32)
    else:
        delta_a = jnp.broadcast_to(
            jnp.asarray(delta, jnp.float32).reshape(B, 1, -1), (B, 1, L)) * scale

    # bf16 weights for the MXU (accumulation stays f32 in-kernel)
    wqkv = params["wqkv"].astype(jnp.bfloat16)
    wo = params["wo"].astype(jnp.bfloat16)
    w1 = params["w1"].astype(jnp.bfloat16)
    w2 = params["w2"].astype(jnp.bfloat16)

    # -------- kernel A: fused QKV projection over flattened (B*L) rows --------
    q, k, v = qkv_project(x, wqkv, params["bqkv"], capacity)

    # -------- kernel B: attention + out-proj + LN1 + FFN + LN2 (+ final LN), q-tiled ------
    has_mask = attn_mask is not None
    fuse_final = final_norm_params is not None
    attn_bytes = jnp.dtype(attn_dtype).itemsize if return_attn else 0
    exp_bytes = jnp.dtype(exp_dtype).itemsize

    budget = _vmem_budget(capacity)
    est_fn = lambda t: _estimate_layer_vmem(t, L, D, d_ff, n_heads, d_head,
                                            attn_bytes, exp_bytes)
    tq = _choose_seq_tile(L, lambda t: est_fn(t) <= budget)
    n_qt = L // tq
    est_b = est_fn(tq)

    in_specs = [
        pl.BlockSpec((1, tq, D), lambda b, qi: (b, qi, 0)),   # x (residual input)
        pl.BlockSpec((1, tq, D), lambda b, qi: (b, qi, 0)),   # q tile
        pl.BlockSpec((1, L, D), lambda b, qi: (b, 0, 0)),     # k (full sequence, per sample)
        pl.BlockSpec((1, L, D), lambda b, qi: (b, 0, 0)),     # v
        pl.BlockSpec(memory_space=pltpu.MemorySpace.SMEM),    # tau, (B,) scalar per sample
        pl.BlockSpec((1, 1, L), lambda b, qi: (b, 0, 0)),     # scale*delta
    ]
    args = [x, q, k, v, tau_a, delta_a]
    if has_mask:
        mask_a = jnp.asarray(attn_mask, jnp.float32).reshape(L, L)
        in_specs.append(pl.BlockSpec((tq, L), lambda b, qi: (qi, 0)))
        args.append(mask_a)
    in_specs += [
        _const_spec((D, D)), _const_spec((1, D)),             # wo, bo
        _const_spec((1, D)), _const_spec((1, D)),             # ln1 gamma, beta
        _const_spec((D, d_ff)), _const_spec((1, d_ff)),       # conv1 W, b
        _const_spec((d_ff, D)), _const_spec((1, D)),          # conv2 W, b
        _const_spec((1, D)), _const_spec((1, D)),             # ln2 gamma, beta
    ]
    args += [wo, params["bo"], params["ln1_g"], params["ln1_b"],
             w1, params["c1"], w2, params["c2"],
             params["ln2_g"], params["ln2_b"]]
    if fuse_final:
        in_specs += [_const_spec((1, D)), _const_spec((1, D))]
        args += [jnp.asarray(final_norm_params["g"]).reshape(1, D),
                 jnp.asarray(final_norm_params["b"]).reshape(1, D)]

    if return_attn:
        out_shape = (jax.ShapeDtypeStruct((B, L, D), x.dtype),
                     jax.ShapeDtypeStruct((B, n_heads, L, L), attn_dtype))
        out_specs = (pl.BlockSpec((1, tq, D), lambda b, qi: (b, qi, 0)),
                     pl.BlockSpec((1, n_heads, tq, L), lambda b, qi: (b, 0, qi, 0)))
    else:
        out_shape = jax.ShapeDtypeStruct((B, L, D), x.dtype)
        out_specs = pl.BlockSpec((1, tq, D), lambda b, qi: (b, qi, 0))

    res = pl.pallas_call(
        functools.partial(encoder_layer_kernel, n_heads=n_heads, d_head=d_head,
                          eps=eps, has_mask=has_mask, fuse_final_norm=fuse_final,
                          return_attn=return_attn, exp_dtype=exp_dtype),
        grid=(B, n_qt),
        in_specs=in_specs,
        out_specs=out_specs,
        out_shape=out_shape,
        scratch_shapes=[pltpu.VMEM((L, n_heads, d_head), jnp.bfloat16),
                        pltpu.VMEM((L, n_heads, d_head), jnp.bfloat16)],
        compiler_params=pltpu.CompilerParams(
            # qi carries the per-sample K/V head-split cache in scratch -> "arbitrary";
            # b is independent -> "parallel" (megacore sharding on v7x).
            dimension_semantics=("parallel", "arbitrary"),
            vmem_limit_bytes=_vmem_limit(est_b, capacity)),
    )(*args)

    if return_attn:
        out, attn = res
        return out, attn
    return res, None


# ----------------------------------------------------------------------------- Encoder.forward
def encoder_forward(x, layer_params, norm_params=None, *, n_heads,
                    tau=None, delta=None, attn_mask=None, eps=1e-5,
                    attn_dtype=jnp.bfloat16, return_attns=True):
    # Encoder.forward, conv_layers=None path: stack EncoderLayers, collect attns, final norm.
    attns = []
    n = len(layer_params)
    for i, lp in enumerate(layer_params):
        fuse = norm_params if (norm_params is not None and i == n - 1) else None
        x, attn = encoder_layer(x, lp, n_heads=n_heads, tau=tau, delta=delta,
                                attn_mask=attn_mask, eps=eps, attn_dtype=attn_dtype,
                                return_attn=return_attns, final_norm_params=fuse)
        attns.append(attn)
    if norm_params is not None and n == 0:
        x = layer_norm(x, norm_params["g"], norm_params["b"], eps=eps)
    return x, attns


# ----------------------------------------------------------------------------- params
def make_layer_params(key, d_model, d_ff, dtype=jnp.float32):
    ks = jax.random.split(key, 6)
    s = 0.1
    return {
        # fused QKV projection: [Wq | Wk | Wv] stored as (d_model, 3*d_model)
        "wqkv": jax.random.normal(ks[0], (d_model, 3 * d_model), dtype) * s,
        "bqkv": jnp.zeros((1, 3 * d_model), dtype),
        "wo": jax.random.normal(ks[1], (d_model, d_model), dtype) * s,
        "bo": jnp.zeros((1, d_model), dtype),
        "ln1_g": jnp.ones((1, d_model), dtype),
        "ln1_b": jnp.zeros((1, d_model), dtype),
        # conv1 (k=1): PyTorch weight (d_ff, d_model, 1) -> stored (d_model, d_ff)
        "w1": jax.random.normal(ks[2], (d_model, d_ff), dtype) * s,
        "c1": jax.random.normal(ks[3], (1, d_ff), dtype) * s,
        # conv2 (k=1): PyTorch weight (d_model, d_ff, 1) -> stored (d_ff, d_model)
        "w2": jax.random.normal(ks[4], (d_ff, d_model), dtype) * s,
        "c2": jax.random.normal(ks[5], (1, d_model), dtype) * s,
        "ln2_g": jnp.ones((1, d_model), dtype),
        "ln2_b": jnp.zeros((1, d_model), dtype),
    }


if __name__ == "__main__":
    B, L, d_model, n_heads = 2, 8, 32, 4
    d_ff = 4 * d_model
    n_layers = 2

    key = jax.random.PRNGKey(0)
    k_x, k_t, k_d, k_p = jax.random.split(key, 4)
    x = jax.random.normal(k_x, (B, L, d_model), jnp.float32)
    tau = jnp.exp(0.1 * jax.random.normal(k_t, (B, 1, 1), jnp.float32))   # per-sample tau
    delta = 0.1 * jax.random.normal(k_d, (B, 1, L), jnp.float32)          # per-(sample,key) delta

    layer_keys = jax.random.split(k_p, n_layers)
    layers = [make_layer_params(k, d_model, d_ff) for k in layer_keys]
    norm_params = {"g": jnp.ones((1, d_model), jnp.float32),
                   "b": jnp.zeros((1, d_model), jnp.float32)}

    out, attns = encoder_forward(x, layers, norm_params, n_heads=n_heads,
                                 tau=tau, delta=delta, attn_mask=None)
    jax.block_until_ready((out, attns))
    assert out.shape == (B, L, d_model)
    assert len(attns) == n_layers
    assert all(a.shape == (B, n_heads, L, L) for a in attns)
    assert bool(jnp.all(jnp.isfinite(out)))
    print("KERNEL_OK")
</pallas_src>

<mosaic_0001>
module attributes {stable_mosaic.version = 11 : i64} {
  func.func @qkv_proj_kernel(%arg0: i32, %arg1: memref<16x32xf32, #tpu.memory_space<vmem>>, %arg2: memref<32x96xbf16, #tpu.memory_space<vmem>>, %arg3: memref<1x96xf32, #tpu.memory_space<vmem>>, %arg4: memref<16x32xbf16, #tpu.memory_space<vmem>>, %arg5: memref<16x32xbf16, #tpu.memory_space<vmem>>, %arg6: memref<16x32xbf16, #tpu.memory_space<vmem>>) attributes {dimension_semantics = [#tpu.dimension_semantics<parallel>], iteration_bounds = array<i64: 1>, scalar_prefetch = 0 : i64, scratch_operands = 0 : i64, tpu.core_type = #tpu.core_type<tc>, window_params = [{transform_indices = @transform_0, window_bounds = array<i64: 16, 32>}, {pipeline_mode = #tpu.pipeline_mode<synchronous>, transform_indices = @transform_1, window_bounds = array<i64: 32, 96>}, {pipeline_mode = #tpu.pipeline_mode<synchronous>, transform_indices = @transform_2, window_bounds = array<i64: 1, 96>}, {transform_indices = @transform_3, window_bounds = array<i64: 16, 32>}, {transform_indices = @transform_4, window_bounds = array<i64: 16, 32>}, {transform_indices = @transform_5, window_bounds = array<i64: 16, 32>}]} {
    %c0 = arith.constant 0 : index
    %c0_0 = arith.constant 0 : index
    %0 = vector.load %arg1[%c0, %c0_0] : memref<16x32xf32, #tpu.memory_space<vmem>>, vector<16x32xf32>
    %1 = arith.truncf %0 : vector<16x32xf32> to vector<16x32xbf16>
    %c0_1 = arith.constant 0 : index
    %c0_2 = arith.constant 0 : index
    %2 = vector.load %arg2[%c0_1, %c0_2] : memref<32x96xbf16, #tpu.memory_space<vmem>>, vector<32x96xbf16>
    %cst = arith.constant dense<0.000000e+00> : vector<16x96xf32>
    %3 = tpu.matmul %1, %2, %cst {dimension_numbers = #tpu.dot_dimension_numbers<[1], [0], [0], [1], [0, 0, 1, 1], [], []>} : vector<16x32xbf16>, vector<32x96xbf16>, vector<16x96xf32> -> vector<16x96xf32>
    %c0_3 = arith.constant 0 : index
    %c0_4 = arith.constant 0 : index
    %4 = vector.load %arg3[%c0_3, %c0_4] : memref<1x96xf32, #tpu.memory_space<vmem>>, vector<1x96xf32>
    %5 = vector.broadcast %4 : vector<1x96xf32> to vector<16x96xf32>
    %6 = arith.addf %3, %5 : vector<16x96xf32>
    %7 = vector.extract_strided_slice %6 {offsets = [0, 0], sizes = [16, 32], strides = [1, 1]} : vector<16x96xf32> to vector<16x32xf32>
    %8 = arith.truncf %7 : vector<16x32xf32> to vector<16x32xbf16>
    %c0_5 = arith.constant 0 : index
    %c0_6 = arith.constant 0 : index
    %9 = vector.load %arg4[%c0_5, %c0_6] : memref<16x32xbf16, #tpu.memory_space<vmem>>, vector<16x32xbf16>
    tpu.vector_store %arg4[%c0_5, %c0_6], %8 {strides = array<i32>} : memref<16x32xbf16, #tpu.memory_space<vmem>>, vector<16x32xbf16>,
    %10 = vector.extract_strided_slice %6 {offsets = [0, 32], sizes = [16, 32], strides = [1, 1]} : vector<16x96xf32> to vector<16x32xf32>
    %11 = arith.truncf %10 : vector<16x32xf32> to vector<16x32xbf16>
    %c0_7 = arith.constant 0 : index
    %c0_8 = arith.constant 0 : index
    %12 = vector.load %arg5[%c0_7, %c0_8] : memref<16x32xbf16, #tpu.memory_space<vmem>>, vector<16x32xbf16>
    tpu.vector_store %arg5[%c0_7, %c0_8], %11 {strides = array<i32>} : memref<16x32xbf16, #tpu.memory_space<vmem>>, vector<16x32xbf16>,
    %13 = vector.extract_strided_slice %6 {offsets = [0, 64], sizes = [16, 32], strides = [1, 1]} : vector<16x96xf32> to vector<16x32xf32>
    %14 = arith.truncf %13 : vector<16x32xf32> to vector<16x32xbf16>
    %c0_9 = arith.constant 0 : index
    %c0_10 = arith.constant 0 : index
    %15 = vector.load %arg6[%c0_9, %c0_10] : memref<16x32xbf16, #tpu.memory_space<vmem>>, vector<16x32xbf16>
    tpu.vector_store %arg6[%c0_9, %c0_10], %14 {strides = array<i32>} : memref<16x32xbf16, #tpu.memory_space<vmem>>, vector<16x32xbf16>,
    return
  }
  func.func @transform_0(%arg0: i32) -> (i32, i32) {
    %c0_i32 = arith.constant 0 : i32
    %c0_i32_0 = arith.constant 0 : i32
    return %arg0, %c0_i32 : i32, i32
  }
  func.func @transform_1(%arg0: i32) -> (i32, i32) {
    %c0_i32 = arith.constant 0 : i32
    %c0_i32_0 = arith.constant 0 : i32
    %c0_i32_1 = arith.constant 0 : i32
    return %c0_i32, %c0_i32_0 : i32, i32
  }
  func.func @transform_2(%arg0: i32) -> (i32, i32) {
    %c0_i32 = arith.constant 0 : i32
    %c0_i32_0 = arith.constant 0 : i32
    %c0_i32_1 = arith.constant 0 : i32
    return %c0_i32, %c0_i32_0 : i32, i32
  }
  func.func @transform_3(%arg0: i32) -> (i32, i32) {
    %c0_i32 = arith.constant 0 : i32
    %c0_i32_0 = arith.constant 0 : i32
    return %arg0, %c0_i32 : i32, i32
  }
  func.func @transform_4(%arg0: i32) -> (i32, i32) {
    %c0_i32 = arith.constant 0 : i32
    %c0_i32_0 = arith.constant 0 : i32
    return %arg0, %c0_i32 : i32, i32
  }
  func.func @transform_5(%arg0: i32) -> (i32, i32) {
    %c0_i32 = arith.constant 0 : i32
    %c0_i32_0 = arith.constant 0 : i32
    return %arg0, %c0_i32 : i32, i32
  }
}

</mosaic_0001>

<bundles_post_ra>
// kernel: tpu_custom_call.1
= control target key start
LH: loop header
LB: loop body
LE: loop exit
PB: predicated region body
PF: predicated region fallthrough
CT: control target
= control target key end

     0   :  { %11 = vsyncpa [#allocation3], 0  ;;  %s416_s0 = inlined_call_operand.hbm [shape: f32[16,32], index: 0, kind: input, shape index: {}]   ;;  %s417_s1 = inlined_call_operand.hbm [shape: bf16[32,96], index: 1, kind: input, shape index: {}]   ;;  %s418_s2 = inlined_call_operand.vmem [shape: f32[1,96], index: 2, kind: input, shape index: {}]   ;;  %s419_s3 = inlined_call_operand.hbm [shape: bf16[16,32], index: 3, kind: output, shape index: {0}]   ;;  %s420_s4 = inlined_call_operand.hbm [shape: bf16[16,32], index: 4, kind: output, shape index: {1}]   ;;  %s421_s5 = inlined_call_operand.hbm [shape: bf16[16,32], index: 5, kind: output, shape index: {2}]  }
   0x1   :  { %12 = vsyncpa [#allocation6], 0 }
   0x2   :  { %13 = vsyncpa [#allocation4], 0 }
   0x3   :  { %14 = vsyncpa [#allocation9], 0  ;;  %s336_s18 = smov [#allocation2]  }
   0x4   :  { %s20_s19 = sshll.u32 %s336_s18, 4  ;;  %s21_s19 = int_to_ptr.vmem [resolvable:$true] %s20_s19 }
   0x5   :  { %s236_s20 = scalar_lea.vmem %s21_s19, 256  ;;  %p241_p1 = scmp.lt.s32.totalorder %s21_s19, %s21_s19 }
   0x6   :  { %p237_p0 = scmp.ne.s32.totalorder %s21_s19, %s236_s20  ;;  %p242_p2 = scmp.lt.s32.totalorder %s236_s20, %s236_s20 }
   0x8   :  { %p243_p3 = por %p242_p2, %p241_p1 }
   0xa   :  { %p244_p4 = pnand %p243_p3, %p237_p0 }
   0xc   :  { %247 = shalt.err (!%p244_p4)
}
   0xd   :  { %s337_s21 = smov 128   ;;  %s338_s22 = smov 8  }
   0xe   :  { %26 = dma.hbm_to_vmem [thread:$0]  %s416_s0, 256, %s21_s19, [#allocation3], %s337_s21, %s337_s21, %s338_s22  }
   0xf   :  { %s339_s25 = smov [#allocation5]  }
  0x10   :  { %s32_s26 = sshll.u32 %s339_s25, 4  ;;  %s33_s26 = int_to_ptr.vmem [resolvable:$true] %s32_s26 }
  0x11   :  { %s256_s27 = scalar_lea.vmem %s33_s26, 256  ;;  %p261_p6 = scmp.lt.s32.totalorder %s33_s26, %s33_s26 }
  0x12   :  { %p257_p5 = scmp.ne.s32.totalorder %s33_s26, %s256_s27  ;;  %p262_p7 = scmp.lt.s32.totalorder %s256_s27, %s256_s27 }
  0x14   :  { %p263_p8 = por %p262_p7, %p261_p6 }
  0x16   :  { %p264_p9 = pnand %p263_p8, %p257_p5 }
  0x18   :  { %267 = shalt.err (!%p264_p9)
}
  0x19   :  { %s340_s28 = smov 64   ;;  %s341_s29 = smov 4  }
  0x1a   :  { %38 = dma.hbm_to_vmem [thread:$0]  %s417_s1, 256, %s33_s26, [#allocation6], %s340_s28, %s340_s28, %s341_s29  }
  0x1b   :  { %328 = dma.done.wait [#allocation3], 256  }
  0x1c   :  { %329 = vsyncadd [#allocation3], 4294967040 }
  0x1d   :  { %330 = dma.done.wait [#allocation6], 256  }
  0x1e   :  { %331 = vsyncadd [#allocation6], 4294967040  ;;  %v342_v0 = vmov 0.0   ;;  %vm343_vm0 = vmmov 0   ;;  %v226_v1 = vld [vmem:[#allocation5 + $0x8] sm:$0xff]   ;;  %v227_v2 = vld [vmem:[#allocation5] sm:$0xff]  }
  0x1f   :  { %206 = vmatprep.subr.bf16.mxu0 %v342_v0  ;;  %210 = vmatprep.mubr.msk.bf16.mxu0 %vm343_vm0, %v342_v0  ;;  %v48_v3 = vld [vmem:[#allocation2] sm:$0xff]  ;;  %v49_v4 = vld [vmem:[#allocation2 + $0x8] sm:$0xff]  ;;  %vm74_vm1 = vcmask 261120   ;;  %vm127_vm2 = vcmask 257024   ;;  %s344_s7 = smov [#allocation7]   ;;  %s345_s9 = smov 96  }
  0x20   :  { %207 = vmatpush3.bf16.msra.mxu0 %v226_v1  ;;  %v50_v5 = vpack.c.bf16 %v49_v4, %v48_v3  ;;  %v195_v6 = vld [vmem:[%s418_s2] ss:$0 sm:$0xff]  ;;  %s151_s8 = sshll.u32 %s344_s7, 4  ;;  %s152_s8 = int_to_ptr.vmem [resolvable:$true] %s151_s8 }
  0x21   :  { %208 = vmatprep.subr.bf16.mxu0 %v342_v0  ;;  %s268_s2 = scalar_lea.vmem %s152_s8, 128  ;;  %p273_p11 = scmp.lt.s32.totalorder %s152_s8, %s152_s8 }
  0x22   :  { %p269_p10 = scmp.ne.s32.totalorder %s152_s8, %s268_s2  ;;  %p274_p12 = scmp.lt.s32.totalorder %s268_s2, %s268_s2 }
  0x24   :  { %209 = vmatpush3.bf16.msra.mxu0 %v227_v2  ;;  %p275_p13 = por %p274_p12, %p273_p11 }
  0x26   :  { %p276_p0 = pnand %p275_p13, %p269_p10 }
  0x27   :  { %211 = vmatmul.mubr.msk.bf16.vlgmr.msra.gmra.mxu0 %vm74_vm1, %v50_v5 }
  0xe7   :  { %v112_v7 = vpop.f32.mrf.mxu0 }
  0xe8   :  { %v113_v8 = vadd.f32 %v195_v6, %v112_v7 }
  0xe9   :  { %v212_v9 = vpop.f32.mrf.mxu0 }
  0xea   :  { %v201_v10 = vpack.c.bf16 %v113_v8, %v113_v8 }
  0xeb   :  { %v115_v11 = vpop.f32.mrf.mxu0 }
  0xec   :  { %v116_v12 = vadd.f32 %v195_v6, %v115_v11  ;;  %138 = vrot.lane.b32.xlu1 %v201_v10, %s340_s28  ;;  %130 = vrot.lane.b32.xlu0 %v201_v10, %s345_s9  ;;  %128 = vst.msk [vmem:[#allocation7] sm:$0xf] %vm127_vm2, %v201_v10 }
  0xed   :  { %v213_v13 = vpop.f32.mrf.mxu0 }
  0xee   :  { %v202_v14 = vpack.c.bf16 %v116_v12, %v116_v12 }
  0xf0   :  { %140 = vrot.lane.b32.xlu1 %v202_v14, %s340_s28  ;;  %132 = vrot.lane.b32.xlu0 %v202_v14, %s345_s9  ;;  %129 = vst.msk [vmem:[#allocation7 + $0x4] sm:$0xf] %vm127_vm2, %v202_v14 }
  0xf1   :  { %279 = shalt.err (!%p276_p0)
}
  0xf2   :  { %157 = dma.vmem_to_hbm [thread:$0]  %s152_s8, 128, %s419_s3, [#allocation4], %s340_s28, %s340_s28, %s341_s29  }
  0xf3   :  { %s346_s12 = smov [#allocation8]   ;;  %s347_s14 = smov [#allocation10]  }
  0xf4   :  { %s163_s13 = sshll.u32 %s346_s12, 4  ;;  %s175_s15 = sshll.u32 %s347_s14, 4  ;;  %s164_s13 = int_to_ptr.vmem [resolvable:$true] %s163_s13  ;;  %s176_s15 = int_to_ptr.vmem [resolvable:$true] %s175_s15 }
  0xf5   :  { %s288_s16 = scalar_lea.vmem %s164_s13, 128  ;;  %p293_p2 = scmp.lt.s32.totalorder %s164_s13, %s164_s13 }
  0xf6   :  { %p289_p1 = scmp.ne.s32.totalorder %s164_s13, %s288_s16  ;;  %p294_p3 = scmp.lt.s32.totalorder %s288_s16, %s288_s16 }
  0xf8   :  { %p295_p4 = por %p294_p3, %p293_p2 }
  0xfa   :  { %p296_p5 = pnand %p295_p4, %p289_p1 }
 0x15e   :  { %v139_v15 = vpop.permute.xlu1 %138  ;;  %v131_v16 = vpop.permute.xlu0 %130 }
 0x15f   :  { %144 = vst.msk [vmem:[#allocation10] sm:$0xf] %vm127_vm2, %v139_v15  ;;  %136 = vst.msk [vmem:[#allocation8] sm:$0xf] %vm127_vm2, %v131_v16 }
 0x162   :  { %v141_v17 = vpop.permute.xlu1 %140  ;;  %v133_v18 = vpop.permute.xlu0 %132 }
 0x163   :  { %145 = vst.msk [vmem:[#allocation10 + $0x4] sm:$0xf] %vm127_vm2, %v141_v17  ;;  %137 = vst.msk [vmem:[#allocation8 + $0x4] sm:$0xf] %vm127_vm2, %v133_v18 }
 0x164   :  { %299 = shalt.err (!%p296_p5)
}
 0x165   :  { %169 = dma.vmem_to_hbm [thread:$0]  %s164_s13, 128, %s420_s4, [#allocation9], %s340_s28, %s340_s28, %s341_s29  }
 0x166   :  { %s308_s18 = scalar_lea.vmem %s176_s15, 128  ;;  %p313_p7 = scmp.lt.s32.totalorder %s176_s15, %s176_s15 }
 0x167   :  { %p309_p6 = scmp.ne.s32.totalorder %s176_s15, %s308_s18  ;;  %p314_p8 = scmp.lt.s32.totalorder %s308_s18, %s308_s18 }
 0x169   :  { %p315_p9 = por %p314_p8, %p313_p7 }
 0x16b   :  { %p316_p10 = pnand %p315_p9, %p309_p6 }
 0x16d   :  { %319 = shalt.err (!%p316_p10)
}
 0x16e   :  { %181 = dma.vmem_to_hbm [thread:$0]  %s176_s15, 128, %s421_s5, [#allocation9], %s340_s28, %s340_s28, %s341_s29  }
 0x16f   :  { %332 = dma.done.wait [#allocation4], 128  }
 0x170   :  { %333 = vsyncadd [#allocation4], 4294967168 }
 0x171   :  { %334 = dma.done.wait [#allocation9], 256  }
 0x172   :  { %335 = vsyncadd [#allocation9], 4294967040 }
 0x173   :  { %191 = vsyncpa [#allocation3], 1 }
 0x174   :  { %192 = vsyncpa [#allocation6], 1 }
 0x175   :  { %193 = vsyncpa [#allocation4], 1 }
 0x176   :  { %194 = vsyncpa [#allocation9], 1 }

</bundles_post_ra>
